<compile_context>
chip_gen: v5e
topology: v5e:2x2
jax: 0.10.0
libtpu: 0.0.40
codegen_flags: <defaults>
</compile_context>

<pallas_src>
import functools
import math

import jax
import jax.numpy as jnp
from jax.experimental import pallas as pl
from jax.experimental.pallas import tpu as pltpu


def _pe_add_kernel(x_ref, c_ref, o_ref, *, tile_s, reps):
    """Add the sinusoidal positional encoding to one seq-tile of x.

    x_ref / o_ref: (tile_s, B*D) lane-dense tiles of the flattened input.
    c_ref:         (2, W) resident per-lane constants; row 0 = inv_freq,
                   row 1 = channel parity (1.0 for odd channels -> cos).
    W == D when reps == B (channel-dedup path), else W == B*D (reps == 1).
    """
    i = pl.program_id(0)

    inv_freq = c_ref[0:1, :]                          # (1, W)
    parity = c_ref[1:2, :]                            # (1, W)

    # Absolute sequence position of every row of this tile.  Padded rows of a
    # ragged last tile compute harmless extra values that are never stored.
    pos = (jax.lax.broadcasted_iota(jnp.int32, (tile_s, 1), 0)
           + i * tile_s).astype(jnp.float32)

    ang = pos * inv_freq                              # (tile_s, W)
    # Exact parity select (matches the PyTorch buffer construction); the
    # transcendental count is 2/reps per output element.
    pe = jnp.where(parity > 0.5, jnp.cos(ang), jnp.sin(ang))
    if reps > 1:
        # Replicate the unique D channels across the batch along lanes.
        # D % 128 == 0 on this path, so these are whole-lane-block copies.
        pe = jnp.concatenate([pe] * reps, axis=-1)

    # Accumulate in f32, cast once at the store (matters for bf16 inputs).
    o_ref[...] = (x_ref[...].astype(jnp.float32) + pe).astype(o_ref.dtype)


def _round_up(n, m):
    return (n + m - 1) // m * m


def _vmem_capacity_bytes():
    try:
        return int(pltpu.get_tpu_info().vmem_capacity_bytes)
    except Exception:
        return 64 << 20  # conservative fallback (v7x per-TensorCore VMEM)


def _choose_tile_s(S, row_bytes, target_block_bytes):
    """Rows per block: multiple of 8, ~target_block_bytes, even grid length."""
    rows = max(8, (target_block_bytes // max(row_bytes, 1)) // 8 * 8)
    rows = min(rows, _round_up(S, 8))
    # Keep >= 2 grid steps whenever S allows (DMA/compute overlap, megacore).
    if rows >= S and S > 8:
        rows = max(8, _round_up(pl.cdiv(S, 2), 8))
    # Prefer an even number of grid steps: v7x shards this axis over 2 TCs.
    n = pl.cdiv(S, rows)
    if n > 1 and n % 2 == 1:
        rows_alt = max(8, _round_up(pl.cdiv(S, n + 1), 8))
        if pl.cdiv(S, rows_alt) % 2 == 0:
            rows = rows_alt
    return rows


def positional_encoding(x, *, max_len=5000, tile_s=None,
                        target_block_bytes=None, donate_x=False):
    """Equivalent of PositionalEncoding(d_model, max_len).forward(x)."""
    if x.ndim == 2:
        S, D = x.shape
        B = 1
    elif x.ndim == 3:
        S, B, D = x.shape
    else:
        raise ValueError("expected 2-D or 3-D seq-first input")
    assert S <= max_len, "seq_len exceeds max_len of the positional table"

    # Free, contiguous collapse -> lane-dense (S, B*D) layout for the kernel.
    x2 = x.reshape(S, B * D)
    itemsize = jnp.dtype(x.dtype).itemsize
    row_bytes = B * D * itemsize

    # Channel-dedup path: compute sin/cos over the unique D channels only and
    # replicate across batch in-lane (whole-lane-block copies need D%128==0).
    dedup = (B > 1) and (D % 128 == 0)
    reps = B if dedup else 1
    W = D if dedup else B * D

    # Per-lane constants, computed once wrapper-side; resident in the kernel.
    ch = jnp.arange(D, dtype=jnp.int32)
    even_idx = ((ch // 2) * 2).astype(jnp.float32)
    inv_freq_d = jnp.exp(even_idx * (-math.log(10000.0) / float(D)))
    parity_d = (ch % 2).astype(jnp.float32)
    if dedup or B == 1:
        inv_freq, parity = inv_freq_d, parity_d
    else:
        # TODO(synk): lane axis could additionally be padded to a multiple of
        # 128 here to turn masked vst.msk stores into full vst for odd B*D.
        inv_freq = jnp.tile(inv_freq_d, B)
        parity = jnp.tile(parity_d, B)
    consts = jnp.stack([inv_freq, parity], axis=0)        # (2, W) float32

    # Generation-aware block sizing + explicit scoped-VMEM limit.
    vmem_cap = _vmem_capacity_bytes()
    if target_block_bytes is None:
        target_block_bytes = min(8 << 20, vmem_cap // 16)
    if tile_s is None:
        tile_s = _choose_tile_s(S, row_bytes, target_block_bytes)
    assert tile_s % 8 == 0 or tile_s == S
    grid = (pl.cdiv(S, tile_s),)
    block_bytes = tile_s * B * D * itemsize
    vmem_limit = int(min(vmem_cap * 0.9, 8 * block_bytes + (8 << 20)))

    kernel = functools.partial(_pe_add_kernel, tile_s=tile_s, reps=reps)

    cost = pl.CostEstimate(
        flops=3 * S * B * D,                         # angle mul + select + add
        transcendentals=2 * S * W,                   # sin + cos, unique channels
        bytes_accessed=2 * S * B * D * itemsize + 2 * W * 4,
    )

    out2 = pl.pallas_call(
        kernel,
        out_shape=jax.ShapeDtypeStruct((S, B * D), x.dtype),
        grid_spec=pltpu.PrefetchScalarGridSpec(
            num_scalar_prefetch=0,
            grid=grid,
            in_specs=[pl.BlockSpec((tile_s, B * D), lambda i: (i, 0)),
                      pl.BlockSpec((2, W), lambda i: (0, 0))],
            out_specs=pl.BlockSpec((tile_s, B * D), lambda i: (i, 0)),
        ),
        compiler_params=pltpu.CompilerParams(
            dimension_semantics=("parallel",),
            vmem_limit_bytes=vmem_limit,
        ),
        cost_estimate=cost,
        input_output_aliases={0: 0} if donate_x else {},
    )(x2, consts)

    return out2.reshape(x.shape)


def _reference_pe(seq_len, d_model, dtype=jnp.float32):
    """Pure-JAX replica of the PyTorch buffer construction (for checking)."""
    position = jnp.arange(seq_len, dtype=jnp.float32)[:, None]
    div_term = jnp.exp(
        jnp.arange(0, d_model, 2, dtype=jnp.float32)
        * (-math.log(10000.0) / d_model)
    )
    ang = position * div_term  # (S, ceil(D/2))
    pe = jnp.zeros((seq_len, d_model), jnp.float32)
    pe = pe.at[:, 0::2].set(jnp.sin(ang))
    if d_model % 2:
        pe = pe.at[:, 1::2].set(jnp.cos(ang[:, :-1]))
    else:
        pe = pe.at[:, 1::2].set(jnp.cos(ang))
    return pe.astype(dtype)


if __name__ == "__main__":
    key = jax.random.PRNGKey(0)
    k1, k2, k3, k4, k5 = jax.random.split(key, 5)

    # --- small 3-D and 2-D cases (fallback path: D % 128 != 0) ---
    seq, batch, d_model = 8, 2, 32
    x3 = jax.random.normal(k1, (seq, batch, d_model), dtype=jnp.float32)
    x2 = jax.random.normal(k2, (seq, d_model), dtype=jnp.float32)
    out3 = jax.block_until_ready(positional_encoding(x3))
    out2 = jax.block_until_ready(positional_encoding(x2))
    pe = _reference_pe(seq, d_model)
    assert out3.shape == x3.shape and out3.dtype == x3.dtype
    assert out2.shape == x2.shape and out2.dtype == x2.dtype
    assert jnp.allclose(out3, x3 + pe[:, None, :], atol=1e-5, rtol=1e-5)
    assert jnp.allclose(out2, x2 + pe, atol=1e-5, rtol=1e-5)

    # --- odd d_model branch of the PyTorch module ---
    d_odd = 33
    x_odd = jax.random.normal(k3, (seq, batch, d_odd), dtype=jnp.float32)
    out_odd = jax.block_until_ready(positional_encoding(x_odd))
    pe_odd = _reference_pe(seq, d_odd)
    assert jnp.allclose(out_odd, x_odd + pe_odd[:, None, :], atol=1e-5, rtol=1e-5)

    # --- ragged S (not a multiple of 8): cdiv grid with masked last tile;
    #     also exercises the channel-dedup (D % 128 == 0) path ---
    S_r, B_r, D_r = 100, 2, 128
    x_r = jax.random.normal(k4, (S_r, B_r, D_r), dtype=jnp.float32)
    out_r = jax.block_until_ready(positional_encoding(x_r))
    pe_r = _reference_pe(S_r, D_r)
    assert jnp.allclose(out_r, x_r + pe_r[:, None, :], atol=1e-5, rtol=1e-5)

    # --- larger case: multi-step grid, dedup path with lane-block concat ---
    S_l, B_l, D_l = 512, 4, 128
    x_l = jax.random.normal(k5, (S_l, B_l, D_l), dtype=jnp.float32)
    out_l = jax.block_until_ready(positional_encoding(x_l))
    pe_l = _reference_pe(S_l, D_l)
    # Slightly looser atol only for sin/cos implementation differences at
    # large arguments (positions up to 511); the phase-fold drift is gone.
    assert jnp.allclose(out_l, x_l + pe_l[:, None, :], atol=1e-4, rtol=1e-5)

    print("KERNEL_OK")
</pallas_src>

<mosaic_0001>
module attributes {stable_mosaic.version = 11 : i64} {
  func.func @_pe_add_kernel(%arg0: i32, %arg1: memref<8x64xf32, #tpu.memory_space<vmem>>, %arg2: memref<2x64xf32, #tpu.memory_space<vmem>>, %arg3: memref<8x64xf32, #tpu.memory_space<vmem>>) attributes {dimension_semantics = [#tpu.dimension_semantics<parallel>], iteration_bounds = array<i64: 1>, scalar_prefetch = 0 : i64, scratch_operands = 0 : i64, tpu.core_type = #tpu.core_type<tc>, window_params = [{transform_indices = @transform_0, window_bounds = array<i64: 8, 64>}, {pipeline_mode = #tpu.pipeline_mode<synchronous>, transform_indices = @transform_1, window_bounds = array<i64: 2, 64>}, {transform_indices = @transform_2, window_bounds = array<i64: 8, 64>}]} {
    %c0 = arith.constant 0 : index
    %c0_0 = arith.constant 0 : index
    %0 = vector.load %arg2[%c0, %c0_0] : memref<2x64xf32, #tpu.memory_space<vmem>>, vector<1x64xf32>
    %c1 = arith.constant 1 : index
    %c0_1 = arith.constant 0 : index
    %1 = vector.load %arg2[%c1, %c0_1] : memref<2x64xf32, #tpu.memory_space<vmem>>, vector<1x64xf32>
    %2 = tpu.iota {dimensions = array<i32: 0>} : vector<8x1xi32>
    %c8_i32 = arith.constant 8 : i32
    %3 = arith.muli %arg0, %c8_i32 : i32
    %4 = vector.broadcast %3 : i32 to vector<8x1xi32>
    %5 = arith.addi %2, %4 : vector<8x1xi32>
    %6 = arith.sitofp %5 : vector<8x1xi32> to vector<8x1xf32>
    %7 = vector.broadcast %6 : vector<8x1xf32> to vector<8x64xf32>
    %8 = vector.broadcast %0 : vector<1x64xf32> to vector<8x64xf32>
    %9 = arith.mulf %7, %8 : vector<8x64xf32>
    %cst = arith.constant 5.000000e-01 : f32
    %10 = vector.broadcast %cst : f32 to vector<1x64xf32>
    %11 = arith.cmpf ogt, %1, %10 : vector<1x64xf32>
    %12 = math.cos %9 : vector<8x64xf32>
    %13 = math.sin %9 : vector<8x64xf32>
    %14 = vector.shape_cast %11 : vector<1x64xi1> to vector<1x64xi1>
    %15 = vector.broadcast %14 : vector<1x64xi1> to vector<8x64xi1>
    %16 = arith.select %15, %12, %13 : vector<8x64xi1>, vector<8x64xf32>
    %c0_2 = arith.constant 0 : index
    %c0_3 = arith.constant 0 : index
    %17 = vector.load %arg1[%c0_2, %c0_3] : memref<8x64xf32, #tpu.memory_space<vmem>>, vector<8x64xf32>
    %18 = arith.addf %17, %16 : vector<8x64xf32>
    %c0_4 = arith.constant 0 : index
    %c0_5 = arith.constant 0 : index
    %19 = vector.load %arg3[%c0_4, %c0_5] : memref<8x64xf32, #tpu.memory_space<vmem>>, vector<8x64xf32>
    tpu.vector_store %arg3[%c0_4, %c0_5], %18 {strides = array<i32>} : memref<8x64xf32, #tpu.memory_space<vmem>>, vector<8x64xf32>,
    return
  }
  func.func @transform_0(%arg0: i32) -> (i32, i32) {
    %c0_i32 = arith.constant 0 : i32
    %c0_i32_0 = arith.constant 0 : i32
    return %arg0, %c0_i32 : i32, i32
  }
  func.func @transform_1(%arg0: i32) -> (i32, i32) {
    %c0_i32 = arith.constant 0 : i32
    %c0_i32_0 = arith.constant 0 : i32
    %c0_i32_1 = arith.constant 0 : i32
    return %c0_i32, %c0_i32_0 : i32, i32
  }
  func.func @transform_2(%arg0: i32) -> (i32, i32) {
    %c0_i32 = arith.constant 0 : i32
    %c0_i32_0 = arith.constant 0 : i32
    return %arg0, %c0_i32 : i32, i32
  }
}

</mosaic_0001>

<bundles_post_ra>
// kernel: tpu_custom_call.1
= control target key start
LH: loop header
LB: loop body
LE: loop exit
PB: predicated region body
PF: predicated region fallthrough
CT: control target
= control target key end

     0   :  { %7 = vsyncpa [#allocation3], 0  ;;  %s566_s0 = inlined_call_operand.hbm [shape: f32[8,64], index: 0, kind: input, shape index: {}]   ;;  %s567_s1 = inlined_call_operand.hbm [shape: f32[2,64], index: 1, kind: input, shape index: {}]   ;;  %s568_s2 = inlined_call_operand.hbm [shape: f32[8,64], index: 2, kind: output, shape index: {}]  }
   0x1   :  { %8 = vsyncpa [#allocation6], 0 }
   0x2   :  { %9 = vsyncpa [#allocation4], 0  ;;  %s15_s11 = sshll.u32 %s566_s0, 4  ;;  %s481_s12 = smov [#allocation2]   ;;  %s16_s11 = int_to_ptr.hbm [resolvable:$true] %s15_s11 }
   0x3   :  { %s17_s13 = sshll.u32 %s481_s12, 4  ;;  %s26_s16 = sshll.u32 %s567_s1, 4  ;;  %s18_s13 = int_to_ptr.vmem [resolvable:$true] %s17_s13  ;;  %s27_s16 = int_to_ptr.hbm [resolvable:$true] %s26_s16 }
   0x4   :  { %20 = dma.hbm_to_vmem [thread:$0]  %s16_s11, 128, %s18_s13, [#allocation3]  }
   0x5   :  { %s482_s17 = smov [#allocation5]  }
   0x6   :  { %s28_s18 = sshll.u32 %s482_s17, 4  ;;  %s29_s18 = int_to_ptr.vmem [resolvable:$true] %s28_s18 }
   0x7   :  { %31 = dma.hbm_to_vmem [thread:$0]  %s27_s16, 32, %s29_s18, [#allocation6]  }
   0x8   :  { %475 = dma.done.wait [#allocation3], 128  }
   0x9   :  { %476 = vsyncadd [#allocation3], 4294967168 }
   0xa   :  { %477 = dma.done.wait [#allocation6], 32  }
   0xb   :  { %478 = vsyncadd [#allocation6], 4294967264  ;;  %v42_v0 = vlaneseq  ;;  %v402_v3 = vld [vmem:[#allocation5] ss:$0 sm:$0xff]  ;;  %v483_v16 = vmov 683565275  }
   0xc   :  { %v484_v18 = vmov 2475754826   ;;  %v485_v20 = vmov 2131351028   ;;  %v486_v22 = vmov 2102212464  }
   0xd   :  { %v43_v1 = vshrl.u32 %v42_v0, 7  ;;  %v487_v24 = vmov 920167782   ;;  %v488_v30 = vmov 1326507024   ;;  %s490_s0 = smov [#allocation7]  }
   0xe   :  { %s373_s1 = sshll.u32 %s490_s0, 4  ;;  %s375_s21 = sshll.u32 %s568_s2, 4  ;;  %s374_s1 = int_to_ptr.vmem [resolvable:$true] %s373_s1  ;;  %s376_s21 = int_to_ptr.hbm [resolvable:$true] %s375_s21 }
   0xf   :  { %v47_v2 = vcvt.s32.f32 %v43_v1 }
  0x11   :  { %v512_v4 = vmul.f32 %v402_v3, %v47_v2 }
  0x13   :  { %v54_v5 = vand.u32 2139095040, %v512_v4  ;;  %v51_v7 = vand.u32 2147483647, %v512_v4  ;;  %vm53_vm12 = vcmp.lt.s32.totalorder %v512_v4, 0 }
  0x15   :  { %v55_v6 = vshrl.u32 %v54_v5, 23  ;;  %v58_v10 = vand.u32 8388607, %v51_v7  ;;  %v489_v5 = vmov 0   ;;  %vm52_vm13 = vcmp.le.f32.partialorder %v51_v7, 0.7853982 }
  0x17   :  { %v386_v8 = vadd.s32 4294967169, %v55_v6  ;;  %v59_v13 = vor.u32 8388608, %v58_v10 }
  0x19   :  { %v61_v9 = vadd.s32 1, %v386_v8  ;;  %v521_v32 = vshll.u32 %v59_v13, 8 }
  0x1b   :  { %vm62_vm0 = vcmp.gt.s32.totalorder %v61_v9, 0  ;;  %v100_v44 = vand.u32 65535, %v521_v32  ;;  %v101_v45 = vshrl.u32 %v521_v32, 16 }
  0x1c   :  { %v63_v11 = vsel %vm62_vm0, %v61_v9, 0 }
  0x1d   :  { %v65_v12 = vand.u32 31, %v63_v11  ;;  %v518_v14 = vshrl.u32 %v63_v11, 5 }
  0x1f   :  { %v66_v15 = vsub.s32 32, %v65_v12  ;;  %v68_v17 = vshll.u32 %v483_v16, %v65_v12  ;;  %v71_v19 = vshll.u32 %v484_v18, %v65_v12  ;;  %v74_v21 = vshll.u32 %v485_v20, %v65_v12 }
  0x20   :  { %v77_v23 = vshll.u32 %v486_v22, %v65_v12  ;;  %v80_v25 = vshll.u32 %v487_v24, %v65_v12  ;;  %vm83_vm1 = vcmp.lt.s32.totalorder %v518_v14, 1  ;;  %vm86_vm2 = vcmp.lt.s32.totalorder %v518_v14, 4 }
  0x21   :  { %v69_v26 = vshrl.u32 %v484_v18, %v66_v15  ;;  %v72_v27 = vshrl.u32 %v485_v20, %v66_v15  ;;  %v75_v28 = vshrl.u32 %v486_v22, %v66_v15  ;;  %v78_v29 = vshrl.u32 %v487_v24, %v66_v15 }
  0x22   :  { %v81_v31 = vshrl.u32 %v488_v30, %v66_v15  ;;  %vm85_vm3 = vcmp.lt.s32.totalorder %v518_v14, 3  ;;  %vm84_vm4 = vcmp.lt.s32.totalorder %v518_v14, 2  ;;  %v67_v52 = vshrl.u32 %v483_v16, %v66_v15 }
  0x23   :  { %v70_v33 = vor.u32 %v69_v26, %v68_v17  ;;  %v73_v34 = vor.u32 %v72_v27, %v71_v19  ;;  %v76_v35 = vor.u32 %v75_v28, %v74_v21  ;;  %v79_v36 = vor.u32 %v78_v29, %v77_v23 }
  0x24   :  { %v82_v37 = vor.u32 %v81_v31, %v80_v25 }
  0x25   :  { %v91_v38 = vsel %vm83_vm1, %v70_v33, %v73_v34  ;;  %v95_v39 = vsel %vm83_vm1, %v73_v34, %v76_v35  ;;  %v92_v40 = vsel %vm86_vm2, %v79_v36, 920167782  ;;  %v87_v1 = vsel %vm83_vm1, %v67_v52, %v70_v33 }
  0x26   :  { %v96_v41 = vsel %vm86_vm2, %v82_v37, 1326507024  ;;  %v93_v42 = vsel %vm85_vm3, %v76_v35, %v92_v40  ;;  %v88_v3 = vsel %vm86_vm2, %v76_v35, 2102212464 }
  0x27   :  { %v97_v43 = vsel %vm85_vm3, %v79_v36, %v96_v41  ;;  %v94_v46 = vsel %vm84_vm4, %v91_v38, %v93_v42  ;;  %v89_v16 = vsel %vm85_vm3, %v73_v34, %v88_v3 }
  0x28   :  { %v98_v47 = vsel %vm84_vm4, %v95_v39, %v97_v43  ;;  %v124_v50 = vand.u32 65535, %v94_v46  ;;  %v125_v51 = vshrl.u32 %v94_v46, 16  ;;  %v90_v24 = vsel %vm84_vm4, %v87_v1, %v89_v16 }
  0x29   :  { %v102_v48 = vand.u32 65535, %v98_v47  ;;  %v103_v49 = vshrl.u32 %v98_v47, 16  ;;  %v144_v28 = vmul.u32 %v521_v32, %v90_v24  ;;  %v364_v24 = vld [vmem:[#allocation2] sm:$0xff] }
  0x2a   :  { %v126_v56 = vmul.u32 %v124_v50, %v100_v44  ;;  %v127_v57 = vmul.u32 %v125_v51, %v100_v44  ;;  %v128_v58 = vmul.u32 %v124_v50, %v101_v45  ;;  %v129_v62 = vmul.u32 %v125_v51, %v101_v45 }
  0x2b   :  { %v104_v53 = vmul.u32 %v102_v48, %v100_v44  ;;  %v105_v54 = vmul.u32 %v103_v49, %v100_v44  ;;  %v106_v55 = vmul.u32 %v102_v48, %v101_v45  ;;  %v107_v59 = vmul.u32 %v103_v49, %v101_v45 }
  0x2c   :  { %v130_v63 = vshll.u32 %v127_v57, 16  ;;  %v132_v0 = vshll.u32 %v128_v58, 16  ;;  %v131_v13 = vshrl.u32 %v127_v57, 16  ;;  %v133_v20 = vshrl.u32 %v128_v58, 16 }
  0x2d   :  { %v108_v60 = vshll.u32 %v105_v54, 16  ;;  %v110_v61 = vshll.u32 %v106_v55, 16  ;;  %v109_v9 = vshrl.u32 %v105_v54, 16  ;;  %v111_v17 = vshrl.u32 %v106_v55, 16 }
  0x2e   :  { %vm134_vm6 = vc.u32 %v126_v56, %v130_v63  ;;  %v136_v8 = vadd.s32 %v130_v63, %v126_v56  ;;  %v41_v63 = vld [vmem:[#allocation5 + $0x1] sm:$0x1] }
  0x2f   :  { %vm112_vm5 = vc.u32 %v104_v53, %v108_v60  ;;  %v114_v2 = vadd.s32 %v108_v60, %v104_v53  ;;  %v135_v11 = vsel %vm134_vm6, 1, %v489_v5  ;;  %vm50_vm14 = vcmp.gt.f32.partialorder %v41_v63, 0.5 }
  0x30   :  { %v113_v6 = vsel %vm112_vm5, 1, %v489_v5  ;;  %v137_v15 = vadd.s32 %v135_v11, %v129_v62  ;;  %vm138_vm8 = vc.u32 %v136_v8, %v132_v0  ;;  %v140_v23 = vadd.s32 %v136_v8, %v132_v0 }
  0x31   :  { %v115_v10 = vadd.s32 %v113_v6, %v107_v59  ;;  %vm116_vm7 = vc.u32 %v114_v2, %v110_v61  ;;  %v139_v19 = vsel %vm138_vm8, 1, %v489_v5  ;;  %v360_v11 = vsel %vm50_vm14, 1, %v489_v5 }
  0x32   :  { %v117_v12 = vsel %vm116_vm7, 1, %v489_v5  ;;  %v141_v21 = vadd.s32 %v139_v19, %v137_v15  ;;  %vm194_vm5 = vweird.f32 %v512_v4  ;;  %vm366_vm7 = vcmask 523264  }
  0x33   :  { %v119_v18 = vadd.s32 %v117_v12, %v115_v10 }
  0x34   :  { %v142_v25 = vadd.s32 %v141_v21, %v131_v13 }
  0x35   :  { %v120_v22 = vadd.s32 %v119_v18, %v109_v9 }
  0x36   :  { %v143_v27 = vadd.s32 %v142_v25, %v133_v20 }
  0x37   :  { %v121_v26 = vadd.s32 %v120_v22, %v111_v17  ;;  %v361_v17 = vperm.slane %v360_v11, 0 }
  0x38   :  { %v147_v29 = vadd.s32 1, %v143_v27 }
  0x39   :  { %vm146_vm9 = vc.u32 %v121_v26, %v140_v23  ;;  %v145_v14 = vadd.s32 %v140_v23, %v121_v26  ;;  %vm362_vm6 = vcmp.eq.s32.totalorder %v361_v17, 1 }
  0x3a   :  { %v148_v30 = vsel %vm146_vm9, %v147_v29, %v143_v27 }
  0x3b   :  { %v149_v31 = vadd.s32 %v148_v30, %v144_v28 }
  0x3d   :  { %v150_v33 = vadd.s32 536870912, %v149_v31 }
  0x3f   :  { %v151_v34 = vshrl.u32 %v150_v33, 30 }
  0x41   :  { %v152_v35 = vshll.u32 %v151_v34, 30  ;;  %v175_v52 = vsub.s32 4, %v151_v34 }
  0x43   :  { %v153_v36 = vsub.s32 %v149_v31, %v152_v35  ;;  %v176_v55 = vsel %vm53_vm12, %v175_v52, %v151_v34 }
  0x44   :  { %v178_v58 = vsel %vm52_vm13, 0, %v176_v55 }
  0x45   :  { %vm154_vm10 = vcmp.lt.s32.totalorder %v153_v36, 0  ;;  %v155_v37 = vsub.s32 0, %v153_v36  ;;  %v349_v0 = vadd.s32 3, %v178_v58  ;;  %v195_v8 = vand.u32 3, %v178_v58 }
  0x47   :  { %v156_v38 = vsel %vm154_vm10, %v155_v37, %v153_v36  ;;  %v350_v7 = vand.u32 3, %v349_v0  ;;  %vm200_vm15 = vcmp.eq.s32.totalorder %v195_v8, 2  ;;  %vm196_vm1 = vcmp.lt.s32.totalorder %v195_v8, 2 }
  0x48   :  { %v157_v39 = vclz %v156_v38  ;;  %vm197_vm2 = vcmp.eq.s32.totalorder %v195_v8, 0 }
  0x49   :  { %vm355_vm0 = vcmp.eq.s32.totalorder %v350_v7, 2  ;;  %vm352_vm3 = vcmp.eq.s32.totalorder %v350_v7, 0  ;;  %vm351_vm4 = vcmp.lt.s32.totalorder %v350_v7, 2 }
  0x4a   :  { %v387_v40 = vadd.s32 4294967294, %v157_v39 }
  0x4c   :  { %vm388_vm11 = vcmp.lt.s32.totalorder %v387_v40, 0 }
  0x4d   :  { %v160_v41 = vsel %vm388_vm11, 0, %v387_v40 }
  0x4e   :  { %v161_v42 = vsub.s32 32, %v160_v41  ;;  %v162_v43 = vshll.u32 %v153_v36, %v160_v41  ;;  %v165_v44 = vsub.s32 4294967266, %v160_v41 }
  0x50   :  { %v163_v32 = vshrl.u32 %v145_v14, %v161_v42  ;;  %v166_v45 = vadd.s32 127, %v165_v44 }
  0x52   :  { %v164_v46 = vor.u32 %v163_v32, %v162_v43  ;;  %v167_v47 = vshll.u32 %v166_v45, 23 }
  0x54   :  { %v168_v48 = vor.u32 4788187, %v167_v47  ;;  %v171_v49 = vcvt.s32.f32 %v164_v46 }
  0x56   :  { %v169_v50 = vand.u32 2147483647, %v168_v48 }
  0x58   :  { %v172_v51 = vmul.f32 %v171_v49, %v169_v50 }
  0x5a   :  { %v173_v53 = vxor.u32 2147483648, %v172_v51 }
  0x5c   :  { %v174_v54 = vsel %vm53_vm12, %v173_v53, %v172_v51 }
  0x5d   :  { %v177_v56 = vsel %vm52_vm13, %v512_v4, %v174_v54 }
  0x5e   :  { %v179_v57 = vmul.f32 %v177_v56, %v177_v56 }
  0x60   :  { %v180_v59 = vmul.f32 -0.001358992, %v179_v57  ;;  %v187_v60 = vmul.f32 -0.00019511016, %v179_v57 }
  0x62   :  { %v181_v61 = vadd.f32 0.041655596, %v180_v59  ;;  %v188_v62 = vadd.f32 0.008332121, %v187_v60 }
  0x64   :  { %v182_v1 = vmul.f32 %v181_v61, %v179_v57  ;;  %v189_v2 = vmul.f32 %v188_v62, %v179_v57 }
  0x66   :  { %v183_v3 = vadd.f32 -0.4999988, %v182_v1  ;;  %v190_v6 = vadd.f32 -0.16666654, %v189_v2 }
  0x68   :  { %v184_v9 = vmul.f32 %v183_v3, %v179_v57  ;;  %v191_v10 = vmul.f32 %v190_v6, %v179_v57 }
  0x6a   :  { %v185_v12 = vadd.f32 1.0, %v184_v9  ;;  %v192_v13 = vadd.f32 1.0, %v191_v10 }
  0x6c   :  { %v193_v15 = vmul.f32 %v192_v13, %v177_v56  ;;  %v201_v16 = vxor.u32 2147483648, %v185_v12 }
  0x6e   :  { %v198_v18 = vxor.u32 2147483648, %v193_v15  ;;  %v202_v19 = vsel %vm200_vm15, %v201_v16, %v193_v15  ;;  %v357_v20 = vsel %vm355_vm0, %v201_v16, %v193_v15 }
  0x70   :  { %v199_v21 = vsel %vm197_vm2, %v185_v12, %v198_v18  ;;  %v354_v22 = vsel %vm352_vm3, %v185_v12, %v198_v18 }
  0x71   :  { %v203_v5 = vsel %vm196_vm1, %v199_v21, %v202_v19  ;;  %v358_v23 = vsel %vm351_vm4, %v354_v22, %v357_v20 }
  0x72   :  { %v204_v25 = vsel %vm194_vm5, nan, %v203_v5  ;;  %v359_v26 = vsel %vm194_vm5, nan, %v358_v23 }
  0x73   :  { %v363_v27 = vsel %vm362_vm6, %v204_v25, %v359_v26 }
  0x74   :  { %v365_v28 = vadd.f32 %v364_v24, %v363_v27 }
  0x76   :  { %367 = vst.msk [vmem:[#allocation7] sm:$0xff] %vm366_vm7, %v365_v28 }
  0x77   :  { %378 = dma.vmem_to_hbm [thread:$0]  %s374_s1, 128, %s376_s21, [#allocation4]  }
  0x78   :  { %479 = dma.done.wait [#allocation4], 128  }
  0x79   :  { %480 = vsyncadd [#allocation4], 4294967168 }
  0x7a   :  { %383 = vsyncpa [#allocation3], 1 }
  0x7b   :  { %384 = vsyncpa [#allocation6], 1 }
  0x7c   :  { %385 = vsyncpa [#allocation4], 1 }

</bundles_post_ra>
